<compile_context>
chip_gen: v7x
topology: tpu7x:2x2x1
jax: 0.10.0
libtpu: 0.0.40
codegen_flags: <defaults>
</compile_context>

<pallas_src>
import jax
import jax.numpy as jnp
from jax.experimental import pallas as pl
from jax.experimental.pallas import tpu as pltpu

PARTS = 6
BN_EPS = 1e-5
NORM_EPS = 1e-12  # F.normalize default eps


# --------------------------------------------------------------------------
# Tiling helpers
# --------------------------------------------------------------------------
def _vmem_capacity_bytes():
    try:
        return int(pltpu.get_tpu_info().vmem_capacity_bytes)
    except Exception:
        return 64 * 1024 * 1024  # conservative fallback (v7x per-core VMEM)


def _largest_aligned_divisor(n, cap, align=8):
    """Largest multiple of `align` that divides n and is <= cap (or None)."""
    best = None
    t = align
    limit = min(n, cap)
    while t <= limit:
        if n % t == 0:
            best = t
        t += align
    return best


def _pick_tiles(B, S, C, itemsize, block_budget):
    """Choose (TB, TS, padded_B) so TB*PARTS*TS*C*itemsize <= block_budget."""
    row_bytes = PARTS * C * itemsize  # one stripe-element row across all parts
    tb_min = min(B, 8)

    # Stripe-chunk tile: full S if a tb_min-sample block fits the budget,
    # otherwise the largest 8-aligned divisor of S that does.
    TS = S
    if row_bytes * S * tb_min > block_budget:
        cap = max(8, block_budget // (row_bytes * tb_min))
        t = _largest_aligned_divisor(S, cap)
        if t is None:
            t = _largest_aligned_divisor(S, S)
        TS = t if t is not None else S

    per_sample = row_bytes * TS
    Bp = B

    if B <= 8:
        TB = B  # output block uses the full batch dim -> no 8-alignment needed
    else:
        # Largest 8-aligned divisor of B within budget, capped at B//2 so the
        # "parallel" batch axis has >= 2 tiles (keeps both v7x TCs busy).
        cap = max(8, min(block_budget // max(1, per_sample), B // 2))
        TB = _largest_aligned_divisor(B, cap)
        if TB is None:
            if B % 8 == 0:
                TB = 8
            elif B * per_sample <= 2 * block_budget:
                TB = B  # B has no 8-aligned divisor; take one full tile
            else:
                # TODO(synk): padding costs an extra pass over the features;
                # only hit when B > 8, not 8-divisible, and too big for a tile.
                Bp = ((B + 7) // 8) * 8
                TB = 8
    return TB, TS, Bp


# --------------------------------------------------------------------------
# Parameter folding (eval-mode BN + adaptive-avg-pool scales into the convs)
# --------------------------------------------------------------------------
def _fold_params(params, S, compute_dtype=jnp.bfloat16):
    g = params["gloab"]
    l = params["local"]
    Cg = g["w"].shape[1]
    Cl = l["w"].shape[2]

    sg = g["gamma"] * jax.lax.rsqrt(g["var"] + BN_EPS)                     # [Cg]
    wg_f = (g["w"] * sg[None, :] * (1.0 / (S * PARTS))).astype(compute_dtype)
    bg_f = ((g["b"] - g["mean"]) * sg + g["beta"]).reshape(1, Cg)
    bg_f = bg_f.astype(jnp.float32)

    sl = l["gamma"] * jax.lax.rsqrt(l["var"] + BN_EPS)                     # [P, Cl]
    wl_f = (l["w"] * sl[:, None, :] * (1.0 / S)).astype(compute_dtype)
    bl_f = ((l["b"] - l["mean"]) * sl + l["beta"]).reshape(1, PARTS * Cl)
    bl_f = bl_f.astype(jnp.float32)
    return wg_f, bg_f, wl_f, bl_f


# --------------------------------------------------------------------------
# Kernel
# --------------------------------------------------------------------------
def _make_kernel(Cl, mm_dtype):
    def kernel(feat_ref, wg_ref, bg_ref, wl_ref, bl_ref, vg_ref, gl_ref, acc_ref):
        # feat_ref: [TB, PARTS, TS, C]  (stripe-element chunk, channels on lanes)
        s_idx = pl.program_id(1)

        @pl.when(s_idx == 0)
        def _init():
            acc_ref[...] = jnp.zeros_like(acc_ref)

        # Raw per-stripe sums over this chunk (sublane-axis reduce, f32 accum).
        acc_ref[...] += jnp.sum(feat_ref[...].astype(jnp.float32), axis=2)

        @pl.when(s_idx == pl.num_programs(1) - 1)
        def _epilogue():
            g_all = acc_ref[...]                                   # [TB, P, C] raw sums

            # gloab branch: global sum -> 1x1 conv (BN + 1/(S*P) folded) -> ReLU
            pooled = jnp.sum(g_all, axis=1).astype(mm_dtype)       # [TB, C]
            y = jnp.dot(pooled, wg_ref[...], preferred_element_type=jnp.float32)
            gl_ref[...] = jnp.maximum(y + bg_ref[...], 0.0)        # [TB, Cg]

            # local branches: per-part 1x1 conv (BN + 1/S folded) -> ReLU,
            # written straight into the lane-dense [TB, PARTS*Cl] output.
            for p in range(PARTS):
                gp = g_all[:, p, :].astype(mm_dtype)               # [TB, C]
                hp = jnp.dot(gp, wl_ref[p], preferred_element_type=jnp.float32)
                hp = jnp.maximum(hp + bl_ref[:, p * Cl:(p + 1) * Cl], 0.0)
                vg_ref[:, p * Cl:(p + 1) * Cl] = hp

            # torch.cat(dim=1) + F.normalize(p=2, dim=1)  (rsqrt on the EUP).
            h = vg_ref[...]
            sq = jnp.sum(h * h, axis=1, keepdims=True)             # [TB, 1]
            vg_ref[...] = h * jax.lax.rsqrt(jnp.maximum(sq, NORM_EPS * NORM_EPS))

    return kernel


# --------------------------------------------------------------------------
# Public wrapper
# --------------------------------------------------------------------------
def pcb_rga_head(features_nhwc, params, *, compute_dtype=jnp.bfloat16):
    """Eval-mode forward of the PCB_RGA head.

    features_nhwc: [B, H, W, C] backbone features in NHWC (the layout a TPU
      backbone emits natively), in the dtype the backbone produced — bf16
      recommended.  The wrapper deliberately does NOT transpose or cast the
      features: both would add a full extra HBM pass over the big tensor.
    Returns (v_g [B, PARTS*Cl], gloab_features [B, Cg]).
    """
    B, H, W, C = features_nhwc.shape
    assert H % PARTS == 0, "H must be divisible by the number of parts"
    S = (H // PARTS) * W

    wg_f, bg_f, wl_f, bl_f = _fold_params(params, S, compute_dtype)
    Cg = wg_f.shape[1]
    Cl = wl_f.shape[2]

    itemsize = features_nhwc.dtype.itemsize
    vmem_cap = _vmem_capacity_bytes()
    # Feature-block budget: big tiles on 128-MiB parts (v5e/v6e), tighter on
    # 64-MiB parts (v7x) so 2x feature + 2x weight buffers still fit.
    block_budget = (24 << 20) if vmem_cap >= (100 << 20) else (10 << 20)

    TB, TS, Bp = _pick_tiles(B, S, C, itemsize, block_budget)

    # Free reshape: splits H into (PARTS, H//PARTS) and merges (H//PARTS, W).
    feat = features_nhwc.reshape(B, PARTS, S, C)
    if Bp != B:
        feat = jnp.pad(feat, ((0, Bp - B), (0, 0), (0, 0), (0, 0)))

    grid = (Bp // TB, S // TS)

    # VMEM bookkeeping: double-buffered inputs/outputs + resident scratch.
    feat_block = TB * PARTS * TS * C * itemsize
    w_bytes = ((wg_f.size + wl_f.size) * wg_f.dtype.itemsize
               + (bg_f.size + bl_f.size) * 4)
    out_block = (TB * PARTS * Cl + TB * Cg) * 4
    scratch_bytes = TB * PARTS * C * 4
    est = 2 * (feat_block + w_bytes + out_block) + scratch_bytes + (4 << 20)
    vmem_limit = int(min(max(est, 16 << 20), vmem_cap - (4 << 20)))

    kernel = _make_kernel(Cl, compute_dtype)

    vg, gl = pl.pallas_call(
        kernel,
        grid=grid,
        in_specs=[
            pl.BlockSpec((TB, PARTS, TS, C), lambda b, s: (b, 0, s, 0)),
            # Constant-index parameter blocks: DMA'd once, resident for the call.
            pl.BlockSpec((C, Cg), lambda b, s: (0, 0)),
            pl.BlockSpec((1, Cg), lambda b, s: (0, 0)),
            pl.BlockSpec((PARTS, C, Cl), lambda b, s: (0, 0, 0)),
            pl.BlockSpec((1, PARTS * Cl), lambda b, s: (0, 0)),
        ],
        out_specs=[
            pl.BlockSpec((TB, PARTS * Cl), lambda b, s: (b, 0)),
            pl.BlockSpec((TB, Cg), lambda b, s: (b, 0)),
        ],
        out_shape=(
            jax.ShapeDtypeStruct((Bp, PARTS * Cl), jnp.float32),
            jax.ShapeDtypeStruct((Bp, Cg), jnp.float32),
        ),
        scratch_shapes=[pltpu.VMEM((TB, PARTS, C), jnp.float32)],
        compiler_params=pltpu.CompilerParams(
            dimension_semantics=("parallel", "arbitrary"),
            vmem_limit_bytes=vmem_limit,
        ),
    )(feat, wg_f, bg_f, wl_f, bl_f)

    if Bp != B:
        vg, gl = vg[:B], gl[:B]
    return vg, gl


# --------------------------------------------------------------------------
# Synthetic parameters + pure-JAX reference
# --------------------------------------------------------------------------
def init_params(key, C, Cg, Cl):
    """Synthetic parameters mirroring the PyTorch module's shapes/init.

    gloab : Conv2d(C, Cg, 1) (kaiming fan_in) + BatchNorm2d(Cg)
            (weights_init_kaiming: gamma ~ N(1, 0.02), beta = 0).
    local : parts x [Conv1d(C, Cl, 1) + BatchNorm1d(Cl)] (PyTorch defaults).
    Running stats are non-trivial so the eval-mode BN fold
    (shift = beta - mean * scale) is actually exercised.
    """
    ks = jax.random.split(key, 8)
    wg = (jax.random.normal(ks[0], (Cg, C), jnp.float32) * jnp.sqrt(2.0 / C)).T
    gloab = dict(
        w=wg,                                                       # [C, Cg]
        b=jnp.zeros((Cg,), jnp.float32),
        gamma=1.0 + 0.02 * jax.random.normal(ks[1], (Cg,), jnp.float32),
        beta=jnp.zeros((Cg,), jnp.float32),
        mean=0.1 * jax.random.normal(ks[2], (Cg,), jnp.float32),
        var=jnp.abs(1.0 + 0.1 * jax.random.normal(ks[3], (Cg,), jnp.float32)),
    )
    bound = 1.0 / jnp.sqrt(float(C))
    local = dict(
        w=jax.random.uniform(ks[4], (PARTS, C, Cl), jnp.float32, -bound, bound),
        b=jax.random.uniform(ks[5], (PARTS, Cl), jnp.float32, -bound, bound),
        gamma=jnp.ones((PARTS, Cl), jnp.float32),
        beta=jnp.zeros((PARTS, Cl), jnp.float32),
        mean=0.1 * jax.random.normal(ks[6], (PARTS, Cl), jnp.float32),
        var=jnp.abs(1.0 + 0.1 * jax.random.normal(ks[7], (PARTS, Cl), jnp.float32)),
    )
    return {"gloab": gloab, "local": local}


def reference(features_nhwc, params, *, compute_dtype=jnp.bfloat16):
    """Pure-JAX mirror of the PyTorch eval forward.

    Uses the same folded (and bf16-rounded) weights and bf16-rounded pooled
    sums as the kernel, so the comparison isolates the kernel logic; the bf16
    rounding itself is the reviewed precision/HBM trade-off, applied here too.
    """
    x = features_nhwc.astype(jnp.float32)
    B, H, W, C = x.shape
    S = (H // PARTS) * W
    wg_f, bg_f, wl_f, bl_f = _fold_params(params, S, compute_dtype)
    Cl = wl_f.shape[2]

    sums = x.reshape(B, PARTS, S, C).sum(axis=2)                    # [B, P, C]
    pooled = sums.sum(axis=1)                                       # [B, C]

    def rd(a):  # mirror the kernel's matmul input rounding
        return a.astype(compute_dtype).astype(jnp.float32)

    gl = jnp.maximum(rd(pooled) @ rd(wg_f) + bg_f, 0.0)
    hs = [
        jnp.maximum(rd(sums[:, p, :]) @ rd(wl_f[p])
                    + bl_f[:, p * Cl:(p + 1) * Cl], 0.0)
        for p in range(PARTS)
    ]
    vg = jnp.concatenate(hs, axis=1)                                # [B, P*Cl]
    norm = jnp.sqrt(jnp.sum(vg * vg, axis=1, keepdims=True))
    return vg / jnp.maximum(norm, NORM_EPS), gl


if __name__ == "__main__":
    # Small shapes consistent with the module: backbone features with H
    # divisible by parts=6; Cg/Cl stand in for the 512/256 head widths.
    B, C, H, W = 2, 128, 12, 4
    Cg, Cl = 64, 32

    key = jax.random.PRNGKey(0)
    kx, kp = jax.random.split(key)
    # Backbone features in NHWC, already bf16 (what a TPU backbone emits).
    feats = jax.random.normal(kx, (B, H, W, C), jnp.float32).astype(jnp.bfloat16)
    params = init_params(kp, C, Cg, Cl)

    v_g, gloab = jax.block_until_ready(pcb_rga_head(feats, params))
    v_ref, g_ref = reference(feats, params)

    assert v_g.shape == (B, PARTS * Cl)
    assert gloab.shape == (B, Cg)
    assert jnp.allclose(v_g, v_ref, atol=2e-3, rtol=2e-3), \
        float(jnp.max(jnp.abs(v_g - v_ref)))
    assert jnp.allclose(gloab, g_ref, atol=2e-3, rtol=2e-3), \
        float(jnp.max(jnp.abs(gloab - g_ref)))

    print("KERNEL_OK")
</pallas_src>

<mosaic_0001>
module attributes {stable_mosaic.version = 11 : i64} {
  func.func @kernel(%arg0: i32, %arg1: i32, %arg2: memref<2x6x8x128xbf16, #tpu.memory_space<vmem>>, %arg3: memref<128x64xbf16, #tpu.memory_space<vmem>>, %arg4: memref<1x64xf32, #tpu.memory_space<vmem>>, %arg5: memref<6x128x32xbf16, #tpu.memory_space<vmem>>, %arg6: memref<1x192xf32, #tpu.memory_space<vmem>>, %arg7: memref<2x192xf32, #tpu.memory_space<vmem>>, %arg8: memref<2x64xf32, #tpu.memory_space<vmem>>, %arg9: memref<2x6x128xf32, #tpu.memory_space<vmem>>) attributes {dimension_semantics = [#tpu.dimension_semantics<parallel>, #tpu.dimension_semantics<arbitrary>], iteration_bounds = array<i64: 1, 1>, scalar_prefetch = 0 : i64, scratch_operands = 1 : i64, tpu.core_type = #tpu.core_type<tc>, window_params = [{transform_indices = @transform_0, window_bounds = array<i64: 2, 6, 8, 128>}, {pipeline_mode = #tpu.pipeline_mode<synchronous>, transform_indices = @transform_1, window_bounds = array<i64: 128, 64>}, {pipeline_mode = #tpu.pipeline_mode<synchronous>, transform_indices = @transform_2, window_bounds = array<i64: 1, 64>}, {pipeline_mode = #tpu.pipeline_mode<synchronous>, transform_indices = @transform_3, window_bounds = array<i64: 6, 128, 32>}, {pipeline_mode = #tpu.pipeline_mode<synchronous>, transform_indices = @transform_4, window_bounds = array<i64: 1, 192>}, {transform_indices = @transform_5, window_bounds = array<i64: 2, 192>}, {transform_indices = @transform_6, window_bounds = array<i64: 2, 64>}]} {
    %c0_i32 = arith.constant 0 : i32
    %0 = arith.cmpi eq, %arg1, %c0_i32 : i32
    %1 = arith.extui %0 : i1 to i32
    %c0_i32_0 = arith.constant 0 : i32
    %2 = arith.cmpi ne, %1, %c0_i32_0 : i32
    scf.if %2 {
      %cst_12 = arith.constant 0.000000e+00 : f32
      %12 = vector.broadcast %cst_12 : f32 to vector<2x6x128xf32>
      %c0_13 = arith.constant 0 : index
      %c0_14 = arith.constant 0 : index
      %c0_15 = arith.constant 0 : index
      %13 = vector.load %arg9[%c0_13, %c0_14, %c0_15] : memref<2x6x128xf32, #tpu.memory_space<vmem>>, vector<2x6x128xf32>
      tpu.vector_store %arg9[%c0_13, %c0_14, %c0_15], %12 {strides = array<i32>} : memref<2x6x128xf32, #tpu.memory_space<vmem>>, vector<2x6x128xf32>,
    } else {
    }
    %c0 = arith.constant 0 : index
    %c0_1 = arith.constant 0 : index
    %c0_2 = arith.constant 0 : index
    %3 = vector.load %arg9[%c0, %c0_1, %c0_2] : memref<2x6x128xf32, #tpu.memory_space<vmem>>, vector<2x6x128xf32>
    %c0_3 = arith.constant 0 : index
    %c0_4 = arith.constant 0 : index
    %c0_5 = arith.constant 0 : index
    %c0_6 = arith.constant 0 : index
    %4 = vector.load %arg2[%c0_3, %c0_4, %c0_5, %c0_6] : memref<2x6x8x128xbf16, #tpu.memory_space<vmem>>, vector<2x6x8x128xbf16>
    %5 = arith.extf %4 : vector<2x6x8x128xbf16> to vector<2x6x8x128xf32>
    %cst = arith.constant dense<0.000000e+00> : vector<2x6x128xf32>
    %6 = vector.multi_reduction <add>, %5, %cst [2] : vector<2x6x8x128xf32> to vector<2x6x128xf32>
    %7 = arith.addf %3, %6 : vector<2x6x128xf32>
    %c0_7 = arith.constant 0 : index
    %c0_8 = arith.constant 0 : index
    %c0_9 = arith.constant 0 : index
    %8 = vector.load %arg9[%c0_7, %c0_8, %c0_9] : memref<2x6x128xf32, #tpu.memory_space<vmem>>, vector<2x6x128xf32>
    tpu.vector_store %arg9[%c0_7, %c0_8, %c0_9], %7 {strides = array<i32>} : memref<2x6x128xf32, #tpu.memory_space<vmem>>, vector<2x6x128xf32>,
    %c0_i32_10 = arith.constant 0 : i32
    %9 = arith.cmpi eq, %arg1, %c0_i32_10 : i32
    %10 = arith.extui %9 : i1 to i32
    %c0_i32_11 = arith.constant 0 : i32
    %11 = arith.cmpi ne, %10, %c0_i32_11 : i32
    scf.if %11 {
      %c0_12 = arith.constant 0 : index
      %c0_13 = arith.constant 0 : index
      %c0_14 = arith.constant 0 : index
      %12 = vector.load %arg9[%c0_12, %c0_13, %c0_14] : memref<2x6x128xf32, #tpu.memory_space<vmem>>, vector<2x6x128xf32>
      %cst_15 = arith.constant dense<0.000000e+00> : vector<2x128xf32>
      %13 = vector.multi_reduction <add>, %12, %cst_15 [1] : vector<2x6x128xf32> to vector<2x128xf32>
      %14 = arith.truncf %13 : vector<2x128xf32> to vector<2x128xbf16>
      %c0_16 = arith.constant 0 : index
      %c0_17 = arith.constant 0 : index
      %15 = vector.load %arg3[%c0_16, %c0_17] : memref<128x64xbf16, #tpu.memory_space<vmem>>, vector<128x64xbf16>
      %cst_18 = arith.constant dense<0.000000e+00> : vector<2x64xf32>
      %16 = tpu.matmul %14, %15, %cst_18 {dimension_numbers = #tpu.dot_dimension_numbers<[1], [0], [0], [1], [0, 0, 1, 1], [], []>} : vector<2x128xbf16>, vector<128x64xbf16>, vector<2x64xf32> -> vector<2x64xf32>
      %c0_19 = arith.constant 0 : index
      %c0_20 = arith.constant 0 : index
      %17 = vector.load %arg4[%c0_19, %c0_20] : memref<1x64xf32, #tpu.memory_space<vmem>>, vector<1x64xf32>
      %18 = vector.broadcast %17 : vector<1x64xf32> to vector<2x64xf32>
      %19 = arith.addf %16, %18 : vector<2x64xf32>
      %cst_21 = arith.constant 0.000000e+00 : f32
      %20 = vector.broadcast %cst_21 : f32 to vector<2x64xf32>
      %21 = arith.maximumf %19, %20 : vector<2x64xf32>
      %c0_22 = arith.constant 0 : index
      %c0_23 = arith.constant 0 : index
      %22 = vector.load %arg8[%c0_22, %c0_23] : memref<2x64xf32, #tpu.memory_space<vmem>>, vector<2x64xf32>
      tpu.vector_store %arg8[%c0_22, %c0_23], %21 {strides = array<i32>} : memref<2x64xf32, #tpu.memory_space<vmem>>, vector<2x64xf32>,
      %23 = vector.extract_strided_slice %12 {offsets = [0, 0, 0], sizes = [2, 1, 128], strides = [1, 1, 1]} : vector<2x6x128xf32> to vector<2x1x128xf32>
      %24 = vector.shape_cast %23 : vector<2x1x128xf32> to vector<2x128xf32>
      %25 = arith.truncf %24 : vector<2x128xf32> to vector<2x128xbf16>
      %c0_24 = arith.constant 0 : index
      %c0_25 = arith.constant 0 : index
      %c0_26 = arith.constant 0 : index
      %26 = vector.load %arg5[%c0_24, %c0_25, %c0_26] : memref<6x128x32xbf16, #tpu.memory_space<vmem>>, vector<1x128x32xbf16>
      %27 = vector.shape_cast %26 : vector<1x128x32xbf16> to vector<128x32xbf16>
      %cst_27 = arith.constant dense<0.000000e+00> : vector<2x32xf32>
      %28 = tpu.matmul %25, %27, %cst_27 {dimension_numbers = #tpu.dot_dimension_numbers<[1], [0], [0], [1], [0, 0, 1, 1], [], []>} : vector<2x128xbf16>, vector<128x32xbf16>, vector<2x32xf32> -> vector<2x32xf32>
      %c0_28 = arith.constant 0 : index
      %c0_29 = arith.constant 0 : index
      %29 = vector.load %arg6[%c0_28, %c0_29] : memref<1x192xf32, #tpu.memory_space<vmem>>, vector<1x32xf32>
      %30 = vector.broadcast %29 : vector<1x32xf32> to vector<2x32xf32>
      %31 = arith.addf %28, %30 : vector<2x32xf32>
      %cst_30 = arith.constant 0.000000e+00 : f32
      %32 = vector.broadcast %cst_30 : f32 to vector<2x32xf32>
      %33 = arith.maximumf %31, %32 : vector<2x32xf32>
      %c0_31 = arith.constant 0 : index
      %c0_32 = arith.constant 0 : index
      %34 = vector.load %arg7[%c0_31, %c0_32] : memref<2x192xf32, #tpu.memory_space<vmem>>, vector<2x32xf32>
      tpu.vector_store %arg7[%c0_31, %c0_32], %33 {strides = array<i32>} : memref<2x192xf32, #tpu.memory_space<vmem>>, vector<2x32xf32>,
      %35 = vector.extract_strided_slice %12 {offsets = [0, 1, 0], sizes = [2, 1, 128], strides = [1, 1, 1]} : vector<2x6x128xf32> to vector<2x1x128xf32>
      %36 = vector.shape_cast %35 : vector<2x1x128xf32> to vector<2x128xf32>
      %37 = arith.truncf %36 : vector<2x128xf32> to vector<2x128xbf16>
      %c1 = arith.constant 1 : index
      %c0_33 = arith.constant 0 : index
      %c0_34 = arith.constant 0 : index
      %38 = vector.load %arg5[%c1, %c0_33, %c0_34] : memref<6x128x32xbf16, #tpu.memory_space<vmem>>, vector<1x128x32xbf16>
      %39 = vector.shape_cast %38 : vector<1x128x32xbf16> to vector<128x32xbf16>
      %cst_35 = arith.constant dense<0.000000e+00> : vector<2x32xf32>
      %40 = tpu.matmul %37, %39, %cst_35 {dimension_numbers = #tpu.dot_dimension_numbers<[1], [0], [0], [1], [0, 0, 1, 1], [], []>} : vector<2x128xbf16>, vector<128x32xbf16>, vector<2x32xf32> -> vector<2x32xf32>
      %c0_36 = arith.constant 0 : index
      %c32 = arith.constant 32 : index
      %41 = vector.load %arg6[%c0_36, %c32] : memref<1x192xf32, #tpu.memory_space<vmem>>, vector<1x32xf32>
      %42 = vector.broadcast %41 : vector<1x32xf32> to vector<2x32xf32>
      %43 = arith.addf %40, %42 : vector<2x32xf32>
      %cst_37 = arith.constant 0.000000e+00 : f32
      %44 = vector.broadcast %cst_37 : f32 to vector<2x32xf32>
      %45 = arith.maximumf %43, %44 : vector<2x32xf32>
      %c0_38 = arith.constant 0 : index
      %c32_39 = arith.constant 32 : index
      %46 = vector.load %arg7[%c0_38, %c32_39] : memref<2x192xf32, #tpu.memory_space<vmem>>, vector<2x32xf32>
      tpu.vector_store %arg7[%c0_38, %c32_39], %45 {strides = array<i32>} : memref<2x192xf32, #tpu.memory_space<vmem>>, vector<2x32xf32>,
      %47 = vector.extract_strided_slice %12 {offsets = [0, 2, 0], sizes = [2, 1, 128], strides = [1, 1, 1]} : vector<2x6x128xf32> to vector<2x1x128xf32>
      %48 = vector.shape_cast %47 : vector<2x1x128xf32> to vector<2x128xf32>
      %49 = arith.truncf %48 : vector<2x128xf32> to vector<2x128xbf16>
      %c2 = arith.constant 2 : index
      %c0_40 = arith.constant 0 : index
      %c0_41 = arith.constant 0 : index
      %50 = vector.load %arg5[%c2, %c0_40, %c0_41] : memref<6x128x32xbf16, #tpu.memory_space<vmem>>, vector<1x128x32xbf16>
      %51 = vector.shape_cast %50 : vector<1x128x32xbf16> to vector<128x32xbf16>
      %cst_42 = arith.constant dense<0.000000e+00> : vector<2x32xf32>
      %52 = tpu.matmul %49, %51, %cst_42 {dimension_numbers = #tpu.dot_dimension_numbers<[1], [0], [0], [1], [0, 0, 1, 1], [], []>} : vector<2x128xbf16>, vector<128x32xbf16>, vector<2x32xf32> -> vector<2x32xf32>
      %c0_43 = arith.constant 0 : index
      %c64 = arith.constant 64 : index
      %53 = vector.load %arg6[%c0_43, %c64] : memref<1x192xf32, #tpu.memory_space<vmem>>, vector<1x32xf32>
      %54 = vector.broadcast %53 : vector<1x32xf32> to vector<2x32xf32>
      %55 = arith.addf %52, %54 : vector<2x32xf32>
      %cst_44 = arith.constant 0.000000e+00 : f32
      %56 = vector.broadcast %cst_44 : f32 to vector<2x32xf32>
      %57 = arith.maximumf %55, %56 : vector<2x32xf32>
      %c0_45 = arith.constant 0 : index
      %c64_46 = arith.constant 64 : index
      %58 = vector.load %arg7[%c0_45, %c64_46] : memref<2x192xf32, #tpu.memory_space<vmem>>, vector<2x32xf32>
      tpu.vector_store %arg7[%c0_45, %c64_46], %57 {strides = array<i32>} : memref<2x192xf32, #tpu.memory_space<vmem>>, vector<2x32xf32>,
      %59 = vector.extract_strided_slice %12 {offsets = [0, 3, 0], sizes = [2, 1, 128], strides = [1, 1, 1]} : vector<2x6x128xf32> to vector<2x1x128xf32>
      %60 = vector.shape_cast %59 : vector<2x1x128xf32> to vector<2x128xf32>
      %61 = arith.truncf %60 : vector<2x128xf32> to vector<2x128xbf16>
      %c3 = arith.constant 3 : index
      %c0_47 = arith.constant 0 : index
      %c0_48 = arith.constant 0 : index
      %62 = vector.load %arg5[%c3, %c0_47, %c0_48] : memref<6x128x32xbf16, #tpu.memory_space<vmem>>, vector<1x128x32xbf16>
      %63 = vector.shape_cast %62 : vector<1x128x32xbf16> to vector<128x32xbf16>
      %cst_49 = arith.constant dense<0.000000e+00> : vector<2x32xf32>
      %64 = tpu.matmul %61, %63, %cst_49 {dimension_numbers = #tpu.dot_dimension_numbers<[1], [0], [0], [1], [0, 0, 1, 1], [], []>} : vector<2x128xbf16>, vector<128x32xbf16>, vector<2x32xf32> -> vector<2x32xf32>
      %c0_50 = arith.constant 0 : index
      %c96 = arith.constant 96 : index
      %65 = vector.load %arg6[%c0_50, %c96] : memref<1x192xf32, #tpu.memory_space<vmem>>, vector<1x32xf32>
      %66 = vector.broadcast %65 : vector<1x32xf32> to vector<2x32xf32>
      %67 = arith.addf %64, %66 : vector<2x32xf32>
      %cst_51 = arith.constant 0.000000e+00 : f32
      %68 = vector.broadcast %cst_51 : f32 to vector<2x32xf32>
      %69 = arith.maximumf %67, %68 : vector<2x32xf32>
      %c0_52 = arith.constant 0 : index
      %c96_53 = arith.constant 96 : index
      %70 = vector.load %arg7[%c0_52, %c96_53] : memref<2x192xf32, #tpu.memory_space<vmem>>, vector<2x32xf32>
      tpu.vector_store %arg7[%c0_52, %c96_53], %69 {strides = array<i32>} : memref<2x192xf32, #tpu.memory_space<vmem>>, vector<2x32xf32>,
      %71 = vector.extract_strided_slice %12 {offsets = [0, 4, 0], sizes = [2, 1, 128], strides = [1, 1, 1]} : vector<2x6x128xf32> to vector<2x1x128xf32>
      %72 = vector.shape_cast %71 : vector<2x1x128xf32> to vector<2x128xf32>
      %73 = arith.truncf %72 : vector<2x128xf32> to vector<2x128xbf16>
      %c4 = arith.constant 4 : index
      %c0_54 = arith.constant 0 : index
      %c0_55 = arith.constant 0 : index
      %74 = vector.load %arg5[%c4, %c0_54, %c0_55] : memref<6x128x32xbf16, #tpu.memory_space<vmem>>, vector<1x128x32xbf16>
      %75 = vector.shape_cast %74 : vector<1x128x32xbf16> to vector<128x32xbf16>
      %cst_56 = arith.constant dense<0.000000e+00> : vector<2x32xf32>
      %76 = tpu.matmul %73, %75, %cst_56 {dimension_numbers = #tpu.dot_dimension_numbers<[1], [0], [0], [1], [0, 0, 1, 1], [], []>} : vector<2x128xbf16>, vector<128x32xbf16>, vector<2x32xf32> -> vector<2x32xf32>
      %c0_57 = arith.constant 0 : index
      %c128 = arith.constant 128 : index
      %77 = vector.load %arg6[%c0_57, %c128] : memref<1x192xf32, #tpu.memory_space<vmem>>, vector<1x32xf32>
      %78 = vector.broadcast %77 : vector<1x32xf32> to vector<2x32xf32>
      %79 = arith.addf %76, %78 : vector<2x32xf32>
      %cst_58 = arith.constant 0.000000e+00 : f32
      %80 = vector.broadcast %cst_58 : f32 to vector<2x32xf32>
      %81 = arith.maximumf %79, %80 : vector<2x32xf32>
      %c0_59 = arith.constant 0 : index
      %c128_60 = arith.constant 128 : index
      %82 = vector.load %arg7[%c0_59, %c128_60] : memref<2x192xf32, #tpu.memory_space<vmem>>, vector<2x32xf32>
      tpu.vector_store %arg7[%c0_59, %c128_60], %81 {strides = array<i32>} : memref<2x192xf32, #tpu.memory_space<vmem>>, vector<2x32xf32>,
      %83 = vector.extract_strided_slice %12 {offsets = [0, 5, 0], sizes = [2, 1, 128], strides = [1, 1, 1]} : vector<2x6x128xf32> to vector<2x1x128xf32>
      %84 = vector.shape_cast %83 : vector<2x1x128xf32> to vector<2x128xf32>
      %85 = arith.truncf %84 : vector<2x128xf32> to vector<2x128xbf16>
      %c5 = arith.constant 5 : index
      %c0_61 = arith.constant 0 : index
      %c0_62 = arith.constant 0 : index
      %86 = vector.load %arg5[%c5, %c0_61, %c0_62] : memref<6x128x32xbf16, #tpu.memory_space<vmem>>, vector<1x128x32xbf16>
      %87 = vector.shape_cast %86 : vector<1x128x32xbf16> to vector<128x32xbf16>
      %cst_63 = arith.constant dense<0.000000e+00> : vector<2x32xf32>
      %88 = tpu.matmul %85, %87, %cst_63 {dimension_numbers = #tpu.dot_dimension_numbers<[1], [0], [0], [1], [0, 0, 1, 1], [], []>} : vector<2x128xbf16>, vector<128x32xbf16>, vector<2x32xf32> -> vector<2x32xf32>
      %c0_64 = arith.constant 0 : index
      %c160 = arith.constant 160 : index
      %89 = vector.load %arg6[%c0_64, %c160] : memref<1x192xf32, #tpu.memory_space<vmem>>, vector<1x32xf32>
      %90 = vector.broadcast %89 : vector<1x32xf32> to vector<2x32xf32>
      %91 = arith.addf %88, %90 : vector<2x32xf32>
      %cst_65 = arith.constant 0.000000e+00 : f32
      %92 = vector.broadcast %cst_65 : f32 to vector<2x32xf32>
      %93 = arith.maximumf %91, %92 : vector<2x32xf32>
      %c0_66 = arith.constant 0 : index
      %c160_67 = arith.constant 160 : index
      %94 = vector.load %arg7[%c0_66, %c160_67] : memref<2x192xf32, #tpu.memory_space<vmem>>, vector<2x32xf32>
      tpu.vector_store %arg7[%c0_66, %c160_67], %93 {strides = array<i32>} : memref<2x192xf32, #tpu.memory_space<vmem>>, vector<2x32xf32>,
      %c0_68 = arith.constant 0 : index
      %c0_69 = arith.constant 0 : index
      %95 = vector.load %arg7[%c0_68, %c0_69] : memref<2x192xf32, #tpu.memory_space<vmem>>, vector<2x192xf32>
      %96 = arith.mulf %95, %95 : vector<2x192xf32>
      %cst_70 = arith.constant dense<0.000000e+00> : vector<2xf32>
      %97 = vector.multi_reduction <add>, %96, %cst_70 [1] : vector<2x192xf32> to vector<2xf32>
      %98 = vector.shape_cast %97 : vector<2xf32> to vector<2x1xf32>
      %cst_71 = arith.constant 1.000000e-24 : f32
      %99 = vector.broadcast %cst_71 : f32 to vector<2x1xf32>
      %100 = arith.maximumf %98, %99 : vector<2x1xf32>
      %101 = math.rsqrt %100 : vector<2x1xf32>
      %102 = vector.broadcast %101 : vector<2x1xf32> to vector<2x192xf32>
      %103 = arith.mulf %95, %102 : vector<2x192xf32>
      %c0_72 = arith.constant 0 : index
      %c0_73 = arith.constant 0 : index
      %104 = vector.load %arg7[%c0_72, %c0_73] : memref<2x192xf32, #tpu.memory_space<vmem>>, vector<2x192xf32>
      tpu.vector_store %arg7[%c0_72, %c0_73], %103 {strides = array<i32>} : memref<2x192xf32, #tpu.memory_space<vmem>>, vector<2x192xf32>,
    } else {
    }
    return
  }
  func.func @transform_0(%arg0: i32, %arg1: i32) -> (i32, i32, i32, i32) {
    %c0_i32 = arith.constant 0 : i32
    %c0_i32_0 = arith.constant 0 : i32
    %c0_i32_1 = arith.constant 0 : i32
    return %arg0, %c0_i32, %arg1, %c0_i32_0 : i32, i32, i32, i32
  }
  func.func @transform_1(%arg0: i32, %arg1: i32) -> (i32, i32) {
    %c0_i32 = arith.constant 0 : i32
    %c0_i32_0 = arith.constant 0 : i32
    %c0_i32_1 = arith.constant 0 : i32
    return %c0_i32, %c0_i32_0 : i32, i32
  }
  func.func @transform_2(%arg0: i32, %arg1: i32) -> (i32, i32) {
    %c0_i32 = arith.constant 0 : i32
    %c0_i32_0 = arith.constant 0 : i32
    %c0_i32_1 = arith.constant 0 : i32
    return %c0_i32, %c0_i32_0 : i32, i32
  }
  func.func @transform_3(%arg0: i32, %arg1: i32) -> (i32, i32, i32) {
    %c0_i32 = arith.constant 0 : i32
    %c0_i32_0 = arith.constant 0 : i32
    %c0_i32_1 = arith.constant 0 : i32
    %c0_i32_2 = arith.constant 0 : i32
    return %c0_i32, %c0_i32_0, %c0_i32_1 : i32, i32, i32
  }
  func.func @transform_4(%arg0: i32, %arg1: i32) -> (i32, i32) {
    %c0_i32 = arith.constant 0 : i32
    %c0_i32_0 = arith.constant 0 : i32
    %c0_i32_1 = arith.constant 0 : i32
    return %c0_i32, %c0_i32_0 : i32, i32
  }
  func.func @transform_5(%arg0: i32, %arg1: i32) -> (i32, i32) {
    %c0_i32 = arith.constant 0 : i32
    %c0_i32_0 = arith.constant 0 : i32
    return %arg0, %c0_i32 : i32, i32
  }
  func.func @transform_6(%arg0: i32, %arg1: i32) -> (i32, i32) {
    %c0_i32 = arith.constant 0 : i32
    %c0_i32_0 = arith.constant 0 : i32
    return %arg0, %c0_i32 : i32, i32
  }
}

</mosaic_0001>

<bundles_post_ra>
// kernel: tpu_custom_call.1
= control target key start
LH: loop header
LB: loop body
LE: loop exit
PB: predicated region body
PF: predicated region fallthrough
CT: control target
= control target key end

     0   :  { %12 = vsyncpa [#allocation4], 0  ;;  %v1630_v1 = vmov 0.0   ;;  %vm1631_vm0 = vmmov 0   ;;  %vm141_vm1 = vcmask 1041409   ;;  %vm143_vm2 = vcmask 1042434   ;;  %s2064_s0 = inlined_call_operand.vmem [shape: bf16[2,6,8,128], index: 0, kind: input, shape index: {}]   ;;  %s2065_s1 = inlined_call_operand.vmem [shape: bf16[128,64], index: 1, kind: input, shape index: {}]   ;;  %s2066_s2 = inlined_call_operand.vmem [shape: f32[1,64], index: 2, kind: input, shape index: {}]   ;;  %s2067_s3 = inlined_call_operand.vmem [shape: bf16[6,128,32], index: 3, kind: input, shape index: {}]   ;;  %s2068_s4 = inlined_call_operand.vmem [shape: f32[1,192], index: 4, kind: input, shape index: {}]   ;;  %s2069_s5 = inlined_call_operand.hbm [shape: f32[2,192], index: 5, kind: output, shape index: {0}]   ;;  %s2070_s6 = inlined_call_operand.hbm [shape: f32[2,64], index: 6, kind: output, shape index: {1}]  }
   0x1   :  { %v1524_v0 = vld [vmem:[%s2065_s1] sm:$0xff]   ;;  %1375 = vmatprep.subr.bf16.mxu0 %v1630_v1  ;;  %29 = vst [vmem:[#allocation2] sm:$0x3f] %v1630_v1  ;;  %30 = vst [vmem:[#allocation2 + $0x8] sm:$0x3f] %v1630_v1  ;;  %1395 = vmatprep.subr.bf16.mxu1 %v1630_v1  ;;  %v1525_v2 = vld [vmem:[%s2065_s1 + $0x8] sm:$0xff]  }
   0x2   :  { %1376 = vmatpush3.bf16.msra.mxu0 %v1524_v0  ;;  %1391 = vmatprep.mubr.msk.bf16.mxu0 %vm1631_vm0, %v1630_v1  ;;  %v1526_v3 = vld [vmem:[%s2065_s1 + $0x10] sm:$0xff]   ;;  %v1527_v4 = vld [vmem:[%s2065_s1 + $0x18] sm:$0xff]   ;;  %v1284_v5 = vld [vmem:[%s2064_s0] sm:$0xff]   ;;  %vm145_vm3 = vcmask 1043459   ;;  %vm147_vm4 = vcmask 1044484   ;;  %vm149_vm5 = vcmask 1045509  }
   0x3   :  { %1377 = vmatprep.subr.bf16.mxu0 %v1630_v1  ;;  %1411 = vmatprep.mubr.msk.bf16.mxu1 %vm1631_vm0, %v1630_v1  ;;  %v1285_v6 = vunpack.c.l.bf16 %v1284_v5  ;;  %v1286_v7 = vunpack.c.h.bf16 %v1284_v5  ;;  %v1307_v8 = vld [vmem:[%s2064_s0 + $0x8] sm:$0xff]   ;;  %v1308_v9 = vld [vmem:[%s2064_s0 + $0x10] sm:$0xff]   ;;  %v1309_v10 = vld [vmem:[%s2064_s0 + $0x18] sm:$0xff]   ;;  %vm167_vm6 = vcmask 1045504   ;;  %s1632_s19 = smov 96   ;;  %s1633_s20 = smov 32  }
   0x4   :  { %v1289_v11 = vunpack.c.l.bf16 %v1307_v8  ;;  %v1290_v12 = vunpack.c.h.bf16 %v1307_v8  ;;  %v1293_v13 = vunpack.c.l.bf16 %v1308_v9  ;;  %v1294_v14 = vunpack.c.h.bf16 %v1308_v9  ;;  %v1711_v15 = vld [vmem:[%s2064_s0 + $0x20] sm:$0xff]   ;;  %v1716_v16 = vld [vmem:[%s2064_s0 + $0x28] sm:$0xff]   ;;  %v1536_v45 = vld [vmem:[%s2067_s3 + $0x10] sm:$0xff]   ;;  %s1634_s24 = smov 64  }
   0x5   :  { %v1297_v17 = vunpack.c.l.bf16 %v1309_v10  ;;  %v1298_v18 = vunpack.c.h.bf16 %v1309_v10  ;;  %v1301_v19 = vunpack.c.l.bf16 %v1711_v15  ;;  %v1302_v20 = vunpack.c.h.bf16 %v1711_v15  ;;  %v1532_v21 = vld [vmem:[%s2067_s3] sm:$0xff]   ;;  %v1534_v27 = vld [vmem:[%s2067_s3 + $0x8] sm:$0xff]   ;;  %v1538_v62 = vld [vmem:[%s2067_s3 + $0x18] sm:$0xff]  }
   0x6   :  { %1378 = vmatpush3.bf16.msra.mxu0 %v1525_v2  ;;  %v1528_v22 = vld [vmem:[%s2065_s1 + $0x20] sm:$0xff]   ;;  %v1305_v23 = vunpack.c.l.bf16 %v1716_v16  ;;  %v1306_v24 = vunpack.c.h.bf16 %v1716_v16  ;;  %v57_v25 = vrot.slane %v1285_v6, 4  ;;  %v63_v26 = vrot.slane %v1286_v7, 4  ;;  %1396 = vmatpush3.bf16.msra.mxu1 %v1532_v21  ;;  %v1529_v40 = vld [vmem:[%s2065_s1 + $0x28] sm:$0xff]  }
   0x7   :  { %1379 = vmatprep.subr.bf16.mxu0 %v1630_v1  ;;  %v69_v28 = vrot.slane %v1289_v11, 4  ;;  %v75_v29 = vrot.slane %v1290_v12, 4  ;;  %v81_v30 = vrot.slane %v1293_v13, 4  ;;  %v87_v31 = vrot.slane %v1294_v14, 4  ;;  %1397 = vmatprep.subr.bf16.mxu1 %v1630_v1  ;;  %v1542_v16 = vld [vmem:[%s2067_s3 + $0x28] sm:$0xff]  }
   0x8   :  { %v58_v32 = vadd.f32 %v1285_v6, %v57_v25  ;;  %v64_v33 = vadd.f32 %v1286_v7, %v63_v26  ;;  %v93_v34 = vrot.slane %v1297_v17, 4  ;;  %v99_v35 = vrot.slane %v1298_v18, 4  ;;  %v1531_v25 = vld [vmem:[%s2065_s1 + $0x38] sm:$0xff]  }
   0x9   :  { %v70_v36 = vadd.f32 %v1289_v11, %v69_v28  ;;  %v76_v37 = vadd.f32 %v1290_v12, %v75_v29  ;;  %v82_v38 = vadd.f32 %v1293_v13, %v81_v30  ;;  %v88_v39 = vadd.f32 %v1294_v14, %v87_v31  ;;  %v1540_v14 = vld [vmem:[%s2067_s3 + $0x20] sm:$0xff]  }
   0xa   :  { %1380 = vmatpush3.bf16.msra.mxu0 %v1526_v3  ;;  %v59_v41 = vrot.slane %v58_v32, 2  ;;  %v65_v42 = vrot.slane %v64_v33, 2  ;;  %v94_v43 = vadd.f32 %v1297_v17, %v93_v34  ;;  %v100_v44 = vadd.f32 %v1298_v18, %v99_v35  ;;  %1398 = vmatpush3.bf16.msra.mxu1 %v1534_v27  ;;  %v31_v29 = vld [vmem:[#allocation2] sm:$0x3f] }
   0xb   :  { %1381 = vmatprep.subr.bf16.mxu0 %v1630_v1  ;;  %v71_v46 = vrot.slane %v70_v36, 2  ;;  %v77_v47 = vrot.slane %v76_v37, 2  ;;  %v83_v48 = vrot.slane %v82_v38, 2  ;;  %v89_v49 = vrot.slane %v88_v39, 2  ;;  %1399 = vmatprep.subr.bf16.mxu1 %v1630_v1 }
   0xc   :  { %v60_v50 = vadd.f32 %v59_v41, %v58_v32  ;;  %v66_v51 = vadd.f32 %v65_v42, %v64_v33  ;;  %v95_v52 = vrot.slane %v94_v43, 2  ;;  %v101_v53 = vrot.slane %v100_v44, 2 }
   0xd   :  { %v72_v54 = vadd.f32 %v71_v46, %v70_v36  ;;  %v78_v55 = vadd.f32 %v77_v47, %v76_v37  ;;  %v84_v56 = vadd.f32 %v83_v48, %v82_v38  ;;  %v90_v57 = vadd.f32 %v89_v49, %v88_v39 }
   0xe   :  { %1382 = vmatpush3.bf16.msra.mxu0 %v1527_v4  ;;  %v61_v58 = vrot.slane %v60_v50, 1  ;;  %v67_v59 = vrot.slane %v66_v51, 1  ;;  %v96_v60 = vadd.f32 %v95_v52, %v94_v43  ;;  %v102_v61 = vadd.f32 %v101_v53, %v100_v44  ;;  %1400 = vmatpush3.bf16.msra.mxu1 %v1536_v45  ;;  %v1530_v4 = vld [vmem:[%s2065_s1 + $0x30] sm:$0xff]  }
   0xf   :  { %1383 = vmatprep.subr.bf16.mxu0 %v1630_v1  ;;  %v73_v63 = vrot.slane %v72_v54, 1  ;;  %v79_v0 = vrot.slane %v78_v55, 1  ;;  %v85_v2 = vrot.slane %v84_v56, 1  ;;  %v91_v3 = vrot.slane %v90_v57, 1  ;;  %1401 = vmatprep.subr.bf16.mxu1 %v1630_v1  ;;  %v1544_v43 = vld [vmem:[%s2067_s3 + $0x30] sm:$0xff]  }
  0x10   :  { %v62_v5 = vadd.f32 %v61_v58, %v60_v50  ;;  %v68_v6 = vadd.f32 %v67_v59, %v66_v51  ;;  %v97_v9 = vrot.slane %v96_v60, 1  ;;  %v103_v11 = vrot.slane %v102_v61, 1  ;;  %v32_v51 = vld [vmem:[#allocation2 + $0x8] sm:$0x3f] }
  0x11   :  { %v74_v7 = vadd.f32 %v73_v63, %v72_v54  ;;  %v80_v8 = vadd.f32 %v79_v0, %v78_v55  ;;  %v86_v10 = vadd.f32 %v85_v2, %v84_v56  ;;  %v105_v12 = vrot.slane %v1301_v19, 4  ;;  %v1546_v54 = vld [vmem:[%s2067_s3 + $0x38] sm:$0xff]  }
  0x12   :  { %1384 = vmatpush3.bf16.msra.mxu0 %v1528_v22  ;;  %v111_v13 = vrot.slane %v1302_v20, 4  ;;  %v92_v17 = vadd.f32 %v91_v3, %v90_v57  ;;  %v117_v18 = vrot.slane %v1305_v23, 4  ;;  %v123_v21 = vrot.slane %v1306_v24, 4  ;;  %1402 = vmatpush3.bf16.msra.mxu1 %v1538_v62 }
  0x13   :  { %1385 = vmatprep.subr.bf16.mxu0 %v1630_v1  ;;  %v142_v22 = vsel %vm141_vm1, %v68_v6, %v62_v5  ;;  %v106_v26 = vadd.f32 %v1301_v19, %v105_v12  ;;  %1403 = vmatprep.subr.bf16.mxu1 %v1630_v1  ;;  %v98_v19 = vadd.f32 %v97_v9, %v96_v60  ;;  %v1548_v12 = vld [vmem:[%s2067_s3 + $0x80] sm:$0xff]  }
  0x14   :  { %v112_v27 = vadd.f32 %v1302_v20, %v111_v13  ;;  %v144_v28 = vsel %vm143_vm2, %v74_v7, %v142_v22  ;;  %v118_v30 = vadd.f32 %v1305_v23, %v117_v18  ;;  %v124_v31 = vadd.f32 %v1306_v24, %v123_v21 }
  0x15   :  { %v146_v32 = vsel %vm145_vm3, %v80_v8, %v144_v28  ;;  %v107_v33 = vrot.slane %v106_v26, 2  ;;  %v104_v34 = vadd.f32 %v103_v11, %v102_v61 }
  0x16   :  { %1386 = vmatpush3.bf16.msra.mxu0 %v1529_v40  ;;  %v113_v15 = vrot.slane %v112_v27, 2  ;;  %v148_v20 = vsel %vm147_vm4, %v86_v10, %v146_v32  ;;  %v119_v35 = vrot.slane %v118_v30, 2  ;;  %v125_v36 = vrot.slane %v124_v31, 2  ;;  %1404 = vmatpush3.bf16.msra.mxu1 %v1540_v14 }
  0x17   :  { %1387 = vmatprep.subr.bf16.mxu0 %v1630_v1  ;;  %v150_v37 = vsel %vm149_vm5, %v92_v17, %v148_v20  ;;  %v108_v23 = vadd.f32 %v107_v33, %v106_v26  ;;  %1405 = vmatprep.subr.bf16.mxu1 %v1630_v1  ;;  %v151_v46 = vsel %vm141_vm1, %v104_v34, %v98_v19  ;;  %v1550_v33 = vld [vmem:[%s2067_s3 + $0x88] sm:$0xff]  }
  0x18   :  { %v114_v24 = vadd.f32 %v113_v15, %v112_v27  ;;  %v158_v38 = vadd.f32 %v150_v37, %v31_v29  ;;  %v120_v39 = vadd.f32 %v119_v35, %v118_v30  ;;  %v126_v40 = vadd.f32 %v125_v36, %v124_v31  ;;  %v1821_v27 = vld [vmem:[%s2068_s4] ss:$0 sm:$0xff]  ;;  %v1839_v15 = vld [vmem:[%s2068_s4 + $0x1] ss:$0 sm:$0xff]  ;;  %v1552_v37 = vld [vmem:[%s2067_s3 + $0x90] sm:$0xff]  }
  0x19   :  { %v109_v41 = vrot.slane %v108_v23, 1  ;;  %504 = vrot.lane.b32.xlu0 %v1821_v27, %s1632_s19  ;;  %770 = vrot.lane.b32.xlu1 %v1821_v27, %s1633_s20 }
  0x1a   :  { %1388 = vmatpush3.bf16.msra.mxu0 %v1530_v4  ;;  %v115_v42 = vrot.slane %v114_v24, 1  ;;  %160 = vst [vmem:[#allocation2] sm:$0x3f] %v158_v38  ;;  %v121_v44 = vrot.slane %v120_v39, 1  ;;  %v127_v45 = vrot.slane %v126_v40, 1  ;;  %1406 = vmatpush3.bf16.msra.mxu1 %v1542_v16 }
  0x1b   :  { %1389 = vmatprep.subr.bf16.mxu0 %v1630_v1  ;;  %v110_v47 = vadd.f32 %v109_v41, %v108_v23  ;;  %1407 = vmatprep.subr.bf16.mxu1 %v1630_v1 }
  0x1c   :  { %v116_v48 = vadd.f32 %v115_v42, %v114_v24  ;;  %v122_v49 = vadd.f32 %v121_v44, %v120_v39  ;;  %v128_v50 = vadd.f32 %v127_v45, %v126_v40 }
  0x1d   :  { %v152_v52 = vsel %vm143_vm2, %v110_v47, %v151_v46  ;;  %637 = vrot.lane.b32.xlu0 %v1821_v27, %s1634_s24  ;;  %1022 = vrot.lane.b32.xlu1 %v1839_v15, %s1632_s19 }
  0x1e   :  { %1390 = vmatpush3.bf16.msra.mxu0 %v1531_v25  ;;  %v153_v53 = vsel %vm145_vm3, %v116_v48, %v152_v52  ;;  %1408 = vmatpush3.bf16.msra.mxu1 %v1544_v43 }
  0x1f   :  { %1415 = vmatprep.subr.bf16.mxu0 %v1630_v1  ;;  %v154_v55 = vsel %vm147_vm4, %v122_v49, %v153_v53  ;;  %1409 = vmatprep.subr.bf16.mxu1 %v1630_v1 }
  0x20   :  { %v155_v56 = vsel %vm149_vm5, %v128_v50, %v154_v55 }
  0x21   :  { %v165_v57 = vld [vmem:[#allocation2] sm:$0x3f]  ;;  %v159_v58 = vadd.f32 %v155_v56, %v32_v51 }
  0x22   :  { %v168_v59 = vsel %vm167_vm6, %v165_v57, 0.0  ;;  %1410 = vmatpush3.bf16.msra.mxu1 %v1546_v54  ;;  %v305_v62 = vpack.c.bf16 %v165_v57, %v165_v57 }
  0x23   :  { %v169_v60 = vrot.slane %v168_v59, 4  ;;  %161 = vst [vmem:[#allocation2 + $0x8] sm:$0x3f] %v159_v58  ;;  %1435 = vmatprep.subr.bf16.mxu1 %v1630_v1 }
  0x24   :  { %v1799_v2 = vunpack.c.l.b16 %v305_v62 }
  0x25   :  { %v170_v61 = vadd.f32 %v169_v60, %v168_v59 }
  0x26   :  { %v717_v6 = vrot.slane %v1799_v2, 3  ;;  %v969_v14 = vrot.slane %v1799_v2, 5  ;;  %v851_v22 = vrot.slane %v1799_v2, 4 }
  0x27   :  { %v171_v63 = vrot.slane %v170_v61, 2 }
  0x29   :  { %v172_v0 = vadd.f32 %v171_v63, %v170_v61 }
  0x2a   :  { %v166_v3 = vld [vmem:[#allocation2 + $0x8] sm:$0x3f] }
  0x2b   :  { %v175_v4 = vsel %vm167_vm6, %v166_v3, 0.0  ;;  %v306_v5 = vpack.c.bf16 %v166_v3, %v166_v3  ;;  %v173_v7 = vrot.slane %v172_v0, 1 }
  0x2c   :  { %v176_v8 = vrot.slane %v175_v4, 4 }
  0x2d   :  { %v1803_v9 = vunpack.c.l.b16 %v306_v5  ;;  %v174_v17 = vadd.f32 %v173_v7, %v172_v0 }
  0x2e   :  { %v177_v10 = vadd.f32 %v176_v8, %v175_v4 }
  0x2f   :  { %v334_v11 = vrot.slane %v1803_v9, 7  ;;  %v718_v13 = vrot.slane %v1803_v9, 2  ;;  %v970_v21 = vrot.slane %v1803_v9, 4  ;;  %v852_v31 = vrot.slane %v1803_v9, 3 }
  0x30   :  { %v178_v18 = vrot.slane %v177_v10, 2  ;;  %v182_v19 = vpack.c.bf16 %v174_v17, %v174_v17 }
  0x31   :  { %v335_v25 = vsel %vm141_vm1, %v334_v11, %v1799_v2  ;;  %v1816_v26 = vsel %vm141_vm1, %v718_v13, %v717_v6  ;;  %v1826_v30 = vsel %vm141_vm1, %v970_v21, %v969_v14  ;;  %v1842_v20 = vsel %vm141_vm1, %v852_v31, %v851_v22 }
  0x32   :  { %v179_v28 = vadd.f32 %v178_v18, %v177_v10  ;;  %v336_v29 = vpack.c.b16 %v335_v25, %v335_v25  ;;  %v209_v36 = vunpack.c.l.b16 %v182_v19 }
  0x34   :  { %v180_v32 = vrot.slane %v179_v28, 1  ;;  %1412 = vmatmul.mubr.bf16.vlgmr.msra.gmra.mrb[0].mxu1 %v336_v29 }
  0x35   :  { %1436 = vmatpush3.bf16.msra.mxu1 %v1548_v12  ;;  %1451 = vmatprep.mubr.msk.bf16.mxu1 %vm1631_vm0, %v1630_v1 }
  0x36   :  { %v181_v34 = vadd.f32 %v180_v32, %v179_v28  ;;  %1437 = vmatprep.subr.bf16.mxu1 %v1630_v1 }
  0x38   :  { %v183_v35 = vpack.c.bf16 %v181_v34, %v181_v34 }
  0x39   :  { %1438 = vmatpush3.bf16.msra.mxu1 %v1550_v33 }
  0x3a   :  { %13 = vsyncpa [#allocation6], 0  ;;  %v210_v16 = vunpack.c.l.b16 %v183_v35  ;;  %1439 = vmatprep.subr.bf16.mxu1 %v1630_v1  ;;  %v1533_v24 = vld [vmem:[%s2067_s3 + $0x40] sm:$0xff]   ;;  %v1554_v39 = vld [vmem:[%s2067_s3 + $0x98] sm:$0xff]   ;;  %v584_v46 = vrot.slane %v1799_v2, 2  ;;  %v585_v47 = vrot.slane %v1803_v9, 1  ;;  %v720_v12 = vpack.c.b16 %v1816_v26, %v1816_v26 }
  0x3b   :  { %v1535_v40 = vld [vmem:[%s2067_s3 + $0x48] sm:$0xff]   ;;  %v1556_v41 = vld [vmem:[%s2067_s3 + $0xa0] sm:$0xff]   ;;  %v1537_v42 = vld [vmem:[%s2067_s3 + $0x50] sm:$0xff]   ;;  %v452_v55 = vrot.slane %v1799_v2, 1  ;;  %v972_v28 = vpack.c.b16 %v1826_v30, %v1826_v30  ;;  %vm427_vm7 = vcmask 254976   ;;  %vm303_vm8 = vcmask 517120  }
  0x3c   :  { %v211_v23 = vsel %vm141_vm1, %v210_v16, %v209_v36  ;;  %v1558_v43 = vld [vmem:[%s2067_s3 + $0xa8] sm:$0xff]   ;;  %v1539_v44 = vld [vmem:[%s2067_s3 + $0x58] sm:$0xff]   ;;  %v1560_v45 = vld [vmem:[%s2067_s3 + $0xb0] sm:$0xff]   ;;  %v586_v50 = vsel %vm141_vm1, %v585_v47, %v584_v46  ;;  %vm559_vm9 = vcmask 517376   ;;  %vm692_vm10 = vcmask 779776  }
  0x3d   :  { %v212_v38 = vpack.c.b16 %v211_v23, %v211_v23  ;;  %1440 = vmatpush3.bf16.msra.mxu1 %v1552_v37  ;;  %v1541_v48 = vld [vmem:[%s2067_s3 + $0x60] sm:$0xff]   ;;  %v1562_v49 = vld [vmem:[%s2067_s3 + $0xb8] sm:$0xff]   ;;  %v1543_v51 = vld [vmem:[%s2067_s3 + $0x68] sm:$0xff]   ;;  %v587_v52 = vpack.c.b16 %v586_v50, %v586_v50  ;;  %v453_v58 = vsel %vm141_vm1, %v1803_v9, %v452_v55  ;;  %v854_v9 = vpack.c.b16 %v1842_v20, %v1842_v20 }
  0x3e   :  { %1441 = vmatprep.subr.bf16.mxu1 %v1630_v1  ;;  %v1572_v53 = vld [vmem:[%s2067_s3 + $0x100] sm:$0xff]   ;;  %v1545_v54 = vld [vmem:[%s2067_s3 + $0x70] sm:$0xff]   ;;  %v1573_v56 = vld [vmem:[%s2067_s3 + $0x108] sm:$0xff]   ;;  %v454_v60 = vpack.c.b16 %v453_v58, %v453_v58  ;;  %v1635_v23 = vmov 1983009808   ;;  %vm825_vm11 = vcmask 1042176  }
  0x3f   :  { %1392 = vmatmul.mubr.bf16.vlgmr.msra.gmra.mrb[0].mxu0 %v212_v38  ;;  %v1547_v57 = vld [vmem:[%s2067_s3 + $0x78] sm:$0xff]   ;;  %v1574_v59 = vld [vmem:[%s2067_s3 + $0x110] sm:$0xff]   ;;  %v1549_v61 = vld [vmem:[%s2067_s3 + $0xc0] sm:$0xff]   ;;  %v552_v38 = vlaneseq  ;;  %vm1091_vm12 = vcmask 1041408  }
  0x40   :  { %1416 = vmatpush3.bf16.msra.mxu0 %v1533_v24  ;;  %1431 = vmatprep.mubr.msk.bf16.mxu0 %vm1631_vm0, %v1630_v1  ;;  %v1575_v62 = vld [vmem:[%s2067_s3 + $0x118] sm:$0xff]   ;;  %v1551_v63 = vld [vmem:[%s2067_s3 + $0xc8] sm:$0xff]   ;;  %v1576_v0 = vld [vmem:[%s2067_s3 + $0x120] sm:$0xff]   ;;  %v550_v24 = vunpack.c.l.s4 %v1635_v23 }
  0x41   :  { %1417 = vmatprep.subr.bf16.mxu0 %v1630_v1  ;;  %1442 = vmatpush3.bf16.msra.mxu1 %v1554_v39  ;;  %v1553_v2 = vld [vmem:[%s2067_s3 + $0xd0] sm:$0xff]   ;;  %v1577_v3 = vld [vmem:[%s2067_s3 + $0x128] sm:$0xff]   ;;  %v1555_v4 = vld [vmem:[%s2067_s3 + $0xd8] sm:$0xff]  }
  0x42   :  { %1443 = vmatprep.subr.bf16.mxu1 %v1630_v1  ;;  %v1578_v5 = vld [vmem:[%s2067_s3 + $0x130] sm:$0xff]   ;;  %v1557_v6 = vld [vmem:[%s2067_s3 + $0xe0] sm:$0xff]   ;;  %v1579_v7 = vld [vmem:[%s2067_s3 + $0x138] sm:$0xff]  }
  0x43   :  { %v1559_v8 = vld [vmem:[%s2067_s3 + $0xe8] sm:$0xff]   ;;  %v1561_v10 = vld [vmem:[%s2067_s3 + $0xf0] sm:$0xff]   ;;  %v1563_v11 = vld [vmem:[%s2067_s3 + $0xf8] sm:$0xff]  }
  0x44   :  { %1418 = vmatpush3.bf16.msra.mxu0 %v1535_v40  ;;  %v1564_v13 = vld [vmem:[%s2067_s3 + $0x140] sm:$0xff]   ;;  %v1565_v14 = vld [vmem:[%s2067_s3 + $0x148] sm:$0xff]   ;;  %v1566_v17 = vld [vmem:[%s2067_s3 + $0x150] sm:$0xff]   ;;  %v551_v40 = vunpack.c.0.s8 %v550_v24 }
  0x45   :  { %1419 = vmatprep.subr.bf16.mxu0 %v1630_v1  ;;  %1444 = vmatpush3.bf16.msra.mxu1 %v1556_v41  ;;  %v1567_v18 = vld [vmem:[%s2067_s3 + $0x158] sm:$0xff]   ;;  %v1568_v21 = vld [vmem:[%s2067_s3 + $0x160] sm:$0xff]   ;;  %v1569_v22 = vld [vmem:[%s2067_s3 + $0x168] sm:$0xff]   ;;  %v2027_v41 = vshrl.u32 %v552_v38, 7 }
  0x46   :  { %1445 = vmatprep.subr.bf16.mxu1 %v1630_v1  ;;  %v1570_v25 = vld [vmem:[%s2067_s3 + $0x170] sm:$0xff]   ;;  %v1571_v26 = vld [vmem:[%s2067_s3 + $0x178] sm:$0xff]   ;;  %v1140_v34 = vld [vmem:[%s2066_s2] ss:$0 sm:$0xff]  ;;  %s1636_s2 = smov [#allocation5]  }
  0x47   :  { %v554_v46 = vsub.s32 %v551_v40, %v2027_v41  ;;  %s1128_s3 = sshll.u32 %s1636_s2, 4  ;;  %s1129_s3 = int_to_ptr.vmem [resolvable:$true] %s1128_s3 }
  0x48   :  { %1420 = vmatpush3.bf16.msra.mxu0 %v1537_v42  ;;  %p1587_p1 = scmp.lt.s32.totalorder %s1129_s3, %s1129_s3 }
  0x49   :  { %1421 = vmatprep.subr.bf16.mxu0 %v1630_v1  ;;  %1446 = vmatpush3.bf16.msra.mxu1 %v1558_v43 }
  0x4a   :  { %1447 = vmatprep.subr.bf16.mxu1 %v1630_v1 }
  0x4c   :  { %1422 = vmatpush3.bf16.msra.mxu0 %v1539_v44 }
  0x4d   :  { %1423 = vmatprep.subr.bf16.mxu0 %v1630_v1  ;;  %1448 = vmatpush3.bf16.msra.mxu1 %v1560_v45 }
  0x4e   :  { %1449 = vmatprep.subr.bf16.mxu1 %v1630_v1 }
  0x50   :  { %1424 = vmatpush3.bf16.msra.mxu0 %v1541_v48 }
  0x51   :  { %1425 = vmatprep.subr.bf16.mxu0 %v1630_v1  ;;  %1450 = vmatpush3.bf16.msra.mxu1 %v1562_v49 }
  0x52   :  { %1475 = vmatprep.subr.bf16.mxu1 %v1630_v1 }
  0x54   :  { %1426 = vmatpush3.bf16.msra.mxu0 %v1543_v51  ;;  %1452 = vmatmul.mubr.bf16.vlgmr.msra.gmra.mrb[4].mxu1 %v587_v52 }
  0x55   :  { %1427 = vmatprep.subr.bf16.mxu0 %v1630_v1  ;;  %1476 = vmatpush3.bf16.msra.mxu1 %v1572_v53 }
  0x56   :  { %1477 = vmatprep.subr.bf16.mxu1 %v1630_v1  ;;  %1491 = vmatprep.mubr.msk.bf16.mxu1 %vm1631_vm0, %v1630_v1 }
  0x58   :  { %1428 = vmatpush3.bf16.msra.mxu0 %v1545_v54 }
  0x59   :  { %1429 = vmatprep.subr.bf16.mxu0 %v1630_v1  ;;  %1478 = vmatpush3.bf16.msra.mxu1 %v1573_v56 }
  0x5a   :  { %1479 = vmatprep.subr.bf16.mxu1 %v1630_v1 }
  0x5c   :  { %1430 = vmatpush3.bf16.msra.mxu0 %v1547_v57 }
  0x5d   :  { %1455 = vmatprep.subr.bf16.mxu0 %v1630_v1  ;;  %1480 = vmatpush3.bf16.msra.mxu1 %v1574_v59 }
  0x5e   :  { %1481 = vmatprep.subr.bf16.mxu1 %v1630_v1 }
  0x5f   :  { %1432 = vmatmul.mubr.bf16.vlgmr.msra.gmra.mrb[4].mxu0 %v454_v60 }
  0x60   :  { %1456 = vmatpush3.bf16.msra.mxu0 %v1549_v61  ;;  %1471 = vmatprep.mubr.msk.bf16.mxu0 %vm1631_vm0, %v1630_v1 }
  0x61   :  { %1457 = vmatprep.subr.bf16.mxu0 %v1630_v1  ;;  %1482 = vmatpush3.bf16.msra.mxu1 %v1575_v62 }
  0x62   :  { %1483 = vmatprep.subr.bf16.mxu1 %v1630_v1 }
  0x64   :  { %1458 = vmatpush3.bf16.msra.mxu0 %v1551_v63 }
  0x65   :  { %1459 = vmatprep.subr.bf16.mxu0 %v1630_v1  ;;  %1484 = vmatpush3.bf16.msra.mxu1 %v1576_v0 }
  0x66   :  { %1485 = vmatprep.subr.bf16.mxu1 %v1630_v1 }
  0x68   :  { %1460 = vmatpush3.bf16.msra.mxu0 %v1553_v2 }
  0x69   :  { %1461 = vmatprep.subr.bf16.mxu0 %v1630_v1  ;;  %1486 = vmatpush3.bf16.msra.mxu1 %v1577_v3 }
  0x6a   :  { %1487 = vmatprep.subr.bf16.mxu1 %v1630_v1 }
  0x6c   :  { %1462 = vmatpush3.bf16.msra.mxu0 %v1555_v4 }
  0x6d   :  { %1463 = vmatprep.subr.bf16.mxu0 %v1630_v1  ;;  %1488 = vmatpush3.bf16.msra.mxu1 %v1578_v5 }
  0x6e   :  { %1489 = vmatprep.subr.bf16.mxu1 %v1630_v1 }
  0x70   :  { %1464 = vmatpush3.bf16.msra.mxu0 %v1557_v6 }
  0x71   :  { %1465 = vmatprep.subr.bf16.mxu0 %v1630_v1  ;;  %1490 = vmatpush3.bf16.msra.mxu1 %v1579_v7 }
  0x74   :  { %1466 = vmatpush3.bf16.msra.mxu0 %v1559_v8  ;;  %1492 = vmatmul.mubr.bf16.vlgmr.msra.gmra.mrb[8].mxu1 %v854_v9 }
  0x75   :  { %1467 = vmatprep.subr.bf16.mxu0 %v1630_v1 }
  0x78   :  { %1468 = vmatpush3.bf16.msra.mxu0 %v1561_v10 }
  0x79   :  { %1469 = vmatprep.subr.bf16.mxu0 %v1630_v1 }
  0x7c   :  { %1470 = vmatpush3.bf16.msra.mxu0 %v1563_v11 }
  0x7d   :  { %1495 = vmatprep.subr.bf16.mxu0 %v1630_v1 }
  0x7f   :  { %1472 = vmatmul.mubr.bf16.vlgmr.msra.gmra.mrb[8].mxu0 %v720_v12 }
  0x80   :  { %1496 = vmatpush3.bf16.msra.mxu0 %v1564_v13  ;;  %1511 = vmatprep.mubr.msk.bf16.mxu0 %vm1631_vm0, %v1630_v1 }
  0x81   :  { %1497 = vmatprep.subr.bf16.mxu0 %v1630_v1 }
  0x84   :  { %1498 = vmatpush3.bf16.msra.mxu0 %v1565_v14 }
  0x85   :  { %1499 = vmatprep.subr.bf16.mxu0 %v1630_v1 }
  0x88   :  { %1500 = vmatpush3.bf16.msra.mxu0 %v1566_v17 }
  0x89   :  { %1501 = vmatprep.subr.bf16.mxu0 %v1630_v1 }
  0x8b   :  { %v771_v63 = vpop.permute.xlu1 %770 }
  0x8c   :  { %1502 = vmatpush3.bf16.msra.mxu0 %v1567_v18 }
  0x8d   :  { %1503 = vmatprep.subr.bf16.mxu0 %v1630_v1 }
  0x8f   :  { %v1023_v8 = vpop.permute.xlu1 %1022 }
  0x90   :  { %1504 = vmatpush3.bf16.msra.mxu0 %v1568_v21 }
  0x91   :  { %1505 = vmatprep.subr.bf16.mxu0 %v1630_v1 }
  0x94   :  { %1506 = vmatpush3.bf16.msra.mxu0 %v1569_v22 }
  0x95   :  { %1507 = vmatprep.subr.bf16.mxu0 %v1630_v1 }
  0x98   :  { %1508 = vmatpush3.bf16.msra.mxu0 %v1570_v25 }
  0x99   :  { %1509 = vmatprep.subr.bf16.mxu0 %v1630_v1 }
  0x9c   :  { %1510 = vmatpush3.bf16.msra.mxu0 %v1571_v26 }
  0x9f   :  { %1512 = vmatmul.mubr.bf16.vlgmr.msra.gmra.mrb[12].mxu0 %v972_v28 }
 0x107   :  { %v420_v29 = vpop.f32.mrb[0].mxu1 }
 0x108   :  { %v421_v31 = vadd.f32 %v1821_v27, %v420_v29  ;;  %v1413_v32 = vpop.f32.mrb[1].mxu1  ;;  %v505_v27 = vpop.permute.xlu0 %504 }
 0x109   :  { %v423_v19 = vpop.f32.mrb[2].mxu1 }
 0x10a   :  { %v426_v33 = vmax.f32 %v421_v31, 0.0  ;;  %v1414_v20 = vpop.f32.mrb[3].mxu1 }
 0x10c   :  { %428 = vst.msk [vmem:[#allocation3] sm:$0x3] %vm427_vm7, %v426_v33  ;;  %v638_v39 = vpop.permute.xlu0 %637 }
 0x112   :  { %v296_v1 = vpop.f32.mrb[0].mxu0 }
 0x113   :  { %v297_v35 = vadd.f32 %v1140_v34, %v296_v1  ;;  %v1393_v36 = vpop.f32.mrb[1].mxu0 }
 0x114   :  { %v299_v30 = vpop.f32.mrb[2].mxu0 }
 0x115   :  { %v302_v37 = vmax.f32 %v297_v35, 0.0  ;;  %v1394_v16 = vpop.f32.mrb[3].mxu0 }
 0x117   :  { %304 = vst.msk [vmem:[#allocation5] sm:$0x3] %vm303_vm8, %v302_v37 }
 0x127   :  { %v674_v42 = vpop.f32.mrb[4].mxu1 }
 0x128   :  { %v675_v43 = vadd.f32 %v674_v42, %v638_v39  ;;  %v1453_v44 = vpop.f32.mrb[5].mxu1 }
 0x129   :  { %v677_v45 = vpop.f32.mrb[6].mxu1 }
 0x12a   :  { %v680_v47 = vmax.f32 %v675_v43, 0.0  ;;  %v1454_v48 = vpop.f32.mrb[7].mxu1 }
 0x12c   :  { %v688_v49 = vrot.slane %v680_v47, %v554_v46 }
 0x12e   :  { %689 = vrot.lane.b32.xlu1 %v688_v49, %s1634_s24 }
 0x132   :  { %v541_v50 = vpop.f32.mrb[4].mxu0 }
 0x133   :  { %v542_v51 = vadd.f32 %v541_v50, %v505_v27  ;;  %v1433_v52 = vpop.f32.mrb[5].mxu0 }
 0x134   :  { %v544_v53 = vpop.f32.mrb[6].mxu0 }
 0x135   :  { %v547_v54 = vmax.f32 %v542_v51, 0.0  ;;  %v1434_v55 = vpop.f32.mrb[7].mxu0 }
 0x137   :  { %v555_v56 = vrot.slane %v547_v54, %v554_v46 }
 0x139   :  { %556 = vrot.lane.b32.xlu0 %v555_v56, %s1633_s20 }
 0x147   :  { %v938_v57 = vpop.f32.mrb[8].mxu1 }
 0x148   :  { %v939_v58 = vadd.f32 %v1839_v15, %v938_v57  ;;  %v1493_v59 = vpop.f32.mrb[9].mxu1 }
 0x149   :  { %v941_v60 = vpop.f32.mrb[10].mxu1 }
 0x14a   :  { %v944_v61 = vmax.f32 %v939_v58, 0.0  ;;  %v1494_v62 = vpop.f32.mrb[11].mxu1 }
 0x14c   :  { %945 = vst.msk [vmem:[#allocation3 + $0x2] sm:$0x3] %vm427_vm7, %v944_v61 }
 0x152   :  { %v807_v0 = vpop.f32.mrb[8].mxu0 }
 0x153   :  { %v808_v2 = vadd.f32 %v807_v0, %v771_v63  ;;  %v1473_v3 = vpop.f32.mrb[9].mxu0 }
 0x154   :  { %v810_v4 = vpop.f32.mrb[10].mxu0 }
 0x155   :  { %v813_v5 = vmax.f32 %v808_v2, 0.0  ;;  %v1474_v6 = vpop.f32.mrb[11].mxu0 }
 0x157   :  { %v821_v7 = vrot.slane %v813_v5, %v554_v46 }
 0x159   :  { %822 = vrot.lane.b32.xlu0 %v821_v7, %s1632_s19  ;;  %s1582_s19 = scalar_lea.vmem %s1129_s3, 32 }
 0x15a   :  { %p1583_p0 = scmp.ne.s32.totalorder %s1129_s3, %s1582_s19  ;;  %p1588_p2 = scmp.lt.s32.totalorder %s1582_s19, %s1582_s19 }
 0x15c   :  { %p1589_p3 = por %p1588_p2, %p1587_p1 }
 0x15e   :  { %p1590_p4 = pnand %p1589_p3, %p1583_p0 }
 0x172   :  { %v1059_v9 = vpop.f32.mrb[12].mxu0 }
 0x173   :  { %v1060_v10 = vadd.f32 %v1059_v9, %v1023_v8  ;;  %v1513_v15 = vpop.f32.mrb[13].mxu0 }
 0x174   :  { %v1062_v11 = vpop.f32.mrb[14].mxu0 }
 0x175   :  { %v1065_v12 = vmax.f32 %v1060_v10, 0.0  ;;  %v1514_v13 = vpop.f32.mrb[15].mxu0 }
 0x177   :  { %v1073_v14 = vrot.slane %v1065_v12, %v554_v46 }
 0x179   :  { %1074 = vrot.lane.b32.xlu1 %v1073_v14, %s1633_s20 }
 0x1a0   :  { %v690_v17 = vpop.permute.xlu1 %689 }
 0x1ab   :  { %v557_v18 = vpop.permute.xlu0 %556 }
 0x1ac   :  { %560 = vst.msk [vmem:[#allocation3] sm:$0x3] %vm559_vm9, %v557_v18 }
 0x1ad   :  { %693 = vst.msk [vmem:[#allocation3] sm:$0x3] %vm692_vm10, %v690_v17 }
 0x1cb   :  { %v823_v21 = vpop.permute.xlu0 %822 }
 0x1cc   :  { %826 = vst.msk [vmem:[#allocation3] sm:$0x3] %vm825_vm11, %v823_v21 }
 0x1eb   :  { %v1075_v22 = vpop.permute.xlu1 %1074 }
 0x1ec   :  { %1077 = vst.msk [vmem:[#allocation3 + $0x2] sm:$0x3] %vm559_vm9, %v1075_v22 }
 0x1f3   :  { %v1078_v25 = vld [vmem:[#allocation3] sm:$0xf] }
 0x1f4   :  { %v1079_v26 = vmul.f32 %v1078_v25, %v1078_v25 }
 0x1f6   :  { %v1087_v28 = vrot.slane %v1079_v26, %v554_v46 }
 0x1f8   :  { %v1088_v29 = vcombine.high %v1087_v28, %v1087_v28  ;;  %v1092_v31 = vsel %vm1091_vm12, %v1087_v28, 0.0 }
 0x1fa   :  { %v1093_v32 = vsel %vm303_vm8, %v1088_v29, 0.0 }
 0x1fb   :  { %v1094_v19 = vadd.f32 %v1093_v32, %v1092_v31 }
 0x1fd   :  { %1095 = vadd.xlane.f32.xlu0 %v1094_v19 }
 0x1fe   :  { %1593 = shalt.err (!%p1590_p4)
}
 0x1ff   :  { %s1594_s30 = scalar_lea.hbm %s2070_s6, 32 }
 0x200   :  { %p1595_p5 = scmp.ne.s32.totalorder %s2070_s6, %s1594_s30  ;;  %p1598_p6 = scmp.lt.u32.totalorder %s1594_s30, %s2070_s6 }
 0x202   :  { %p1600_p7 = pnand %p1598_p6, %p1595_p5 }
 0x204   :  { %1603 = shalt.err (!%p1600_p7)
}
 0x205   :  { %1131 = dma.vmem_to_hbm [thread:$0]  %s1129_s3, 32, %s2070_s6, [#allocation6]   ;;  %v1637_v34 = vmov 269488144   ;;  %vm1109_vm13 = vcmask 519170  }
 0x206   :  { %v1101_v1 = vunpack.c.l.s4 %v1637_v34  ;;  %s1638_s12 = smov [#allocation3]   ;;  %vm1110_vm14 = vmor %vm1109_vm13, %vm1091_vm12 }
 0x207   :  { %s1118_s13 = sshll.u32 %s1638_s12, 4  ;;  %s1119_s13 = int_to_ptr.vmem [resolvable:$true] %s1118_s13 }
 0x208   :  { %v1102_v35 = vunpack.c.0.s8 %v1101_v1  ;;  %s1604_s14 = scalar_lea.vmem %s1119_s13, 64  ;;  %p1609_p9 = scmp.lt.s32.totalorder %s1119_s13, %s1119_s13 }
 0x209   :  { %p1605_p8 = scmp.ne.s32.totalorder %s1119_s13, %s1604_s14  ;;  %p1610_p10 = scmp.lt.s32.totalorder %s1604_s14, %s1604_s14 }
 0x20a   :  { %v1105_v36 = vsub.s32 %v1102_v35, %v2027_v41 }
 0x20b   :  { %p1611_p11 = por %p1610_p10, %p1609_p9 }
 0x20d   :  { %p1612_p12 = pnand %p1611_p11, %p1605_p8 }
 0x28a   :  { %v1096_v33 = vpop.xlane.xlu0 %1095 }
 0x28b   :  { %v1097_v20 = vmax.f32 %v1096_v33, 1e-24 }
 0x28d   :  { %1580 = vrsqrt.f32 %v1097_v20 }
 0x297   :  { %v1581_v30 = vpop.eup %1580 }
 0x298   :  { %v1106_v37 = vrot.slane %v1581_v30, %v1105_v36 }
 0x29a   :  { %v1108_v16 = vmul.f32 %v1106_v37, %v1078_v25 }
 0x29c   :  { %1111 = vst.msk [vmem:[#allocation3] sm:$0xf] %vm1110_vm14, %v1108_v16 }
 0x29d   :  { %1615 = shalt.err (!%p1612_p12)
}
 0x29e   :  { %s1616_s16 = scalar_lea.hbm %s2069_s5, 64 }
 0x29f   :  { %p1617_p13 = scmp.ne.s32.totalorder %s2069_s5, %s1616_s16  ;;  %p1620_p0 = scmp.lt.u32.totalorder %s1616_s16, %s2069_s5 }
 0x2a1   :  { %p1622_p1 = pnand %p1620_p0, %p1617_p13 }
 0x2a3   :  { %1625 = shalt.err (!%p1622_p1)
}
 0x2a4   :  { %1121 = dma.vmem_to_hbm [thread:$0]  %s1119_s13, 64, %s2069_s5, [#allocation4]  }
 0x2a5   :  { %1626 = dma.done.wait [#allocation4], 64  }
 0x2a6   :  { %1627 = vsyncadd [#allocation4], 4294967232 }
 0x2a7   :  { %1628 = dma.done.wait [#allocation6], 32  }
 0x2a8   :  { %1629 = vsyncadd [#allocation6], 4294967264 }
 0x2a9   :  { %1138 = vsyncpa [#allocation4], 1 }
 0x2aa   :  { %1139 = vsyncpa [#allocation6], 1 }

</bundles_post_ra>
